<compile_context>
chip_gen: v7x
topology: tpu7x:2x2x1
jax: 0.10.0
libtpu: 0.0.40
codegen_flags: <defaults>
</compile_context>

<pallas_src>
import jax
import jax.numpy as jnp
from jax.experimental import pallas as pl
from jax.experimental.pallas import tpu as pltpu


def _round_up(n, m):
    return ((n + m - 1) // m) * m


def _qfunc_kernel(obs_ref, act_ref, w1o_ref, w1a_ref, b1_ref,
                  w2_ref, b2_ref, w3_ref, b3_ref, o_ref):
    cdt = w2_ref.dtype

    # Layer 1 (concat fused away): x @ W1 == obs @ W1[:obs_dim] + act @ W1[obs_dim:]
    h = jnp.dot(obs_ref[...], w1o_ref[...], preferred_element_type=jnp.float32)
    h = h + jnp.dot(act_ref[...], w1a_ref[...], preferred_element_type=jnp.float32)
    h = jnp.maximum(h + b1_ref[...], 0.0)          # f32 bias + ReLU (VPU)

    # Layer 2: Linear + ReLU (MXU, f32 accumulation).
    h = jnp.dot(h.astype(cdt), w2_ref[...], preferred_element_type=jnp.float32)
    h = jnp.maximum(h + b2_ref[...], 0.0)

    # Head (H2 -> 1), computed transposed: (1,H2) x (tile_b,H2)^T -> (1,tile_b)
    # so the stored row is lane-dense (unmasked vst, contiguous writeback DMA).
    q = jax.lax.dot_general(w3_ref[...], h.astype(cdt),
                            (((1,), (1,)), ((), ())),
                            preferred_element_type=jnp.float32)
    q = q + b3_ref[0]                              # scalar bias from SMEM
    o_ref[...] = q.reshape(o_ref.shape).astype(o_ref.dtype)


def mlp_q_function(obs, act, params, *, tile_b=2048, compute_dtype=jnp.float32):
    """Pallas forward for MLPQFunction (two hidden layers + linear head).

    obs: (B, ...) observation, flattened to (B, obs_dim)
    act: (B, ...) action, flattened to (B, act_dim)
    params: dict with w1,b1,w2,b2,w3,b3; wK has shape (in, out), bK has (1, out)
    Returns q of shape (B,)  (matches torch.squeeze(q, -1)).
    """
    B = obs.shape[0]
    obs = obs.reshape(B, -1)
    act = act.reshape(B, -1)
    obs_dim, act_dim = obs.shape[1], act.shape[1]

    w1, b1 = params["w1"], params["b1"]
    w2, b2 = params["w2"], params["b2"]
    w3, b3 = params["w3"], params["b3"]
    h1, h2 = w1.shape[1], w2.shape[1]

    cdt = jnp.dtype(compute_dtype)
    obs = obs.astype(cdt)
    act = act.astype(cdt)
    # Split W1 so the kernel never needs the concatenated [obs, act] tensor.
    w1_obs = w1[:obs_dim].astype(cdt)
    w1_act = w1[obs_dim:].astype(cdt)
    w2c = w2.astype(cdt)
    w3_row = w3.reshape(1, h2).astype(cdt)         # (H2, 1) -> (1, H2)
    b1 = b1.reshape(1, h1).astype(jnp.float32)
    b2 = b2.reshape(1, h2).astype(jnp.float32)
    b3 = b3.reshape(1).astype(jnp.float32)         # scalar, goes to SMEM

    # Batch tiling: 16-row alignment covers both f32 (8) and bf16 (16) packing.
    align = 16
    b_al = _round_up(B, align)
    tile = min(_round_up(tile_b, align), b_al)
    # v7x megacore: ensure the "parallel" axis has >=2 grid steps whenever each
    # half-tile would still be a useful size (>=256 rows). No effect on v5e/v6e.
    if b_al >= 512:
        tile = min(tile, _round_up((b_al + 1) // 2, align))
    tile = max(align, tile)
    b_pad = _round_up(B, tile)
    if b_pad != B:
        obs = jnp.pad(obs, ((0, b_pad - B), (0, 0)))
        act = jnp.pad(act, ((0, b_pad - B), (0, 0)))
    num_tiles = b_pad // tile

    d_in = obs_dim + act_dim
    flops = 2 * b_pad * (d_in * h1 + h1 * h2 + h2)
    bytes_accessed = (cdt.itemsize * (b_pad * d_in + d_in * h1 + h1 * h2 + h2)
                      + 4 * (b_pad + h1 + h2 + 1))

    const = lambda i: (0, 0)            # weights/biases resident across the grid
    batch = lambda i: (i, 0)            # activation tiles stream with the grid

    q = pl.pallas_call(
        _qfunc_kernel,
        out_shape=jax.ShapeDtypeStruct((num_tiles, 1, tile), jnp.float32),
        grid=(num_tiles,),
        in_specs=[
            pl.BlockSpec((tile, obs_dim), batch),   # obs tile
            pl.BlockSpec((tile, act_dim), batch),   # act tile
            pl.BlockSpec((obs_dim, h1), const),     # W1_obs (resident)
            pl.BlockSpec((act_dim, h1), const),     # W1_act (resident)
            pl.BlockSpec((1, h1), const),           # b1
            pl.BlockSpec((h1, h2), const),          # W2
            pl.BlockSpec((1, h2), const),           # b2
            pl.BlockSpec((1, h2), const),           # W3 (as a row)
            pl.BlockSpec(memory_space=pltpu.MemorySpace.SMEM),  # b3 scalar
        ],
        out_specs=pl.BlockSpec((1, 1, tile), lambda i: (i, 0, 0)),  # lane-dense
        compiler_params=pltpu.CompilerParams(
            dimension_semantics=("parallel",)),
        cost_estimate=pl.CostEstimate(
            flops=flops, transcendentals=0, bytes_accessed=bytes_accessed),
    )(obs, act, w1_obs, w1_act, b1, w2c, b2, w3_row, b3)

    # (num_tiles, 1, tile) -> (b_pad,) -> drop padded rows.
    return q.reshape(-1)[:B]


def init_params(key, obs_dim, act_dim, hidden_sizes):
    """Deterministic init mimicking PyTorch nn.Linear default (U[-1/sqrt(fan_in), +])."""
    assert len(hidden_sizes) == 2, "kernel implements the 2-hidden-layer MLP head"
    sizes = [obs_dim + act_dim] + list(hidden_sizes) + [1]
    params = {}
    for j in range(len(sizes) - 1):
        fan_in, fan_out = sizes[j], sizes[j + 1]
        key, kw, kb = jax.random.split(key, 3)
        bound = 1.0 / (fan_in ** 0.5)
        params[f"w{j + 1}"] = jax.random.uniform(
            kw, (fan_in, fan_out), jnp.float32, -bound, bound)
        params[f"b{j + 1}"] = jax.random.uniform(
            kb, (1, fan_out), jnp.float32, -bound, bound)
    return params


def reference_forward(obs, act, params):
    B = obs.shape[0]
    x = jnp.concatenate([obs.reshape(B, -1), act.reshape(B, -1)], axis=-1)
    h = jnp.maximum(x @ params["w1"] + params["b1"], 0.0)
    h = jnp.maximum(h @ params["w2"] + params["b2"], 0.0)
    q = h @ params["w3"] + params["b3"]
    return jnp.squeeze(q, -1)


if __name__ == "__main__":
    B, OBS_DIM, ACT_DIM = 100, 24, 8        # B deliberately not tile-aligned (tests padding)
    HIDDEN = (128, 128)                     # MXU/lane-aligned hidden widths

    key = jax.random.PRNGKey(0)
    k_obs, k_act, k_params = jax.random.split(key, 3)

    obs = jax.random.normal(k_obs, (B, OBS_DIM), jnp.float32)
    act = jax.random.normal(k_act, (B, ACT_DIM), jnp.float32)
    params = init_params(k_params, OBS_DIM, ACT_DIM, HIDDEN)

    q_ref = reference_forward(obs, act, params)

    # f32 path: must match the reference tightly.
    q = jax.block_until_ready(mlp_q_function(obs, act, params))
    assert q.shape == (B,), q.shape
    assert jnp.allclose(q, q_ref, atol=1e-4, rtol=1e-4), (q, q_ref)

    # bf16 compute path (v6e/v7x MXU + DMA win); f32 accumulation -> loose check.
    q_bf16 = jax.block_until_ready(
        mlp_q_function(obs, act, params, compute_dtype=jnp.bfloat16))
    assert q_bf16.shape == (B,), q_bf16.shape
    assert jnp.allclose(q_bf16, q_ref, atol=5e-2, rtol=5e-2), (q_bf16, q_ref)

    print("KERNEL_OK")
</pallas_src>

<mosaic_0001>
module attributes {stable_mosaic.version = 11 : i64} {
  func.func @_qfunc_kernel(%arg0: i32, %arg1: memref<112x24xf32, #tpu.memory_space<vmem>>, %arg2: memref<112x8xf32, #tpu.memory_space<vmem>>, %arg3: memref<24x128xf32, #tpu.memory_space<vmem>>, %arg4: memref<8x128xf32, #tpu.memory_space<vmem>>, %arg5: memref<1x128xf32, #tpu.memory_space<vmem>>, %arg6: memref<128x128xf32, #tpu.memory_space<vmem>>, %arg7: memref<1x128xf32, #tpu.memory_space<vmem>>, %arg8: memref<1x128xf32, #tpu.memory_space<vmem>>, %arg9: memref<1xf32, #tpu.memory_space<smem>>, %arg10: memref<1x1x112xf32, #tpu.memory_space<vmem>>) attributes {dimension_semantics = [#tpu.dimension_semantics<parallel>], iteration_bounds = array<i64: 1>, scalar_prefetch = 0 : i64, scratch_operands = 0 : i64, tpu.core_type = #tpu.core_type<tc>, window_params = [{transform_indices = @transform_0, window_bounds = array<i64: 112, 24>}, {transform_indices = @transform_1, window_bounds = array<i64: 112, 8>}, {pipeline_mode = #tpu.pipeline_mode<synchronous>, transform_indices = @transform_2, window_bounds = array<i64: 24, 128>}, {pipeline_mode = #tpu.pipeline_mode<synchronous>, transform_indices = @transform_3, window_bounds = array<i64: 8, 128>}, {pipeline_mode = #tpu.pipeline_mode<synchronous>, transform_indices = @transform_4, window_bounds = array<i64: 1, 128>}, {pipeline_mode = #tpu.pipeline_mode<synchronous>, transform_indices = @transform_5, window_bounds = array<i64: 128, 128>}, {pipeline_mode = #tpu.pipeline_mode<synchronous>, transform_indices = @transform_6, window_bounds = array<i64: 1, 128>}, {pipeline_mode = #tpu.pipeline_mode<synchronous>, transform_indices = @transform_7, window_bounds = array<i64: 1, 128>}, {transform_indices = @transform_8, window_bounds = array<i64: 1>}, {transform_indices = @transform_9, window_bounds = array<i64: 1, 1, 112>}]} {
    %c0 = arith.constant 0 : index
    %c0_0 = arith.constant 0 : index
    %0 = vector.load %arg1[%c0, %c0_0] : memref<112x24xf32, #tpu.memory_space<vmem>>, vector<112x24xf32>
    %c0_1 = arith.constant 0 : index
    %c0_2 = arith.constant 0 : index
    %1 = vector.load %arg3[%c0_1, %c0_2] : memref<24x128xf32, #tpu.memory_space<vmem>>, vector<24x128xf32>
    %cst = arith.constant dense<0.000000e+00> : vector<112x128xf32>
    %2 = tpu.matmul %0, %1, %cst {dimension_numbers = #tpu.dot_dimension_numbers<[1], [0], [0], [1], [0, 0, 1, 1], [], []>} : vector<112x24xf32>, vector<24x128xf32>, vector<112x128xf32> -> vector<112x128xf32>
    %c0_3 = arith.constant 0 : index
    %c0_4 = arith.constant 0 : index
    %3 = vector.load %arg2[%c0_3, %c0_4] : memref<112x8xf32, #tpu.memory_space<vmem>>, vector<112x8xf32>
    %c0_5 = arith.constant 0 : index
    %c0_6 = arith.constant 0 : index
    %4 = vector.load %arg4[%c0_5, %c0_6] : memref<8x128xf32, #tpu.memory_space<vmem>>, vector<8x128xf32>
    %cst_7 = arith.constant dense<0.000000e+00> : vector<112x128xf32>
    %5 = tpu.matmul %3, %4, %cst_7 {dimension_numbers = #tpu.dot_dimension_numbers<[1], [0], [0], [1], [0, 0, 1, 1], [], []>} : vector<112x8xf32>, vector<8x128xf32>, vector<112x128xf32> -> vector<112x128xf32>
    %6 = arith.addf %2, %5 : vector<112x128xf32>
    %c0_8 = arith.constant 0 : index
    %c0_9 = arith.constant 0 : index
    %7 = vector.load %arg5[%c0_8, %c0_9] : memref<1x128xf32, #tpu.memory_space<vmem>>, vector<1x128xf32>
    %8 = vector.broadcast %7 : vector<1x128xf32> to vector<112x128xf32>
    %9 = arith.addf %6, %8 : vector<112x128xf32>
    %cst_10 = arith.constant 0.000000e+00 : f32
    %10 = vector.broadcast %cst_10 : f32 to vector<112x128xf32>
    %11 = arith.maximumf %9, %10 : vector<112x128xf32>
    %c0_11 = arith.constant 0 : index
    %c0_12 = arith.constant 0 : index
    %12 = vector.load %arg6[%c0_11, %c0_12] : memref<128x128xf32, #tpu.memory_space<vmem>>, vector<128x128xf32>
    %cst_13 = arith.constant dense<0.000000e+00> : vector<112x128xf32>
    %13 = tpu.matmul %11, %12, %cst_13 {dimension_numbers = #tpu.dot_dimension_numbers<[1], [0], [0], [1], [0, 0, 1, 1], [], []>} : vector<112x128xf32>, vector<128x128xf32>, vector<112x128xf32> -> vector<112x128xf32>
    %c0_14 = arith.constant 0 : index
    %c0_15 = arith.constant 0 : index
    %14 = vector.load %arg7[%c0_14, %c0_15] : memref<1x128xf32, #tpu.memory_space<vmem>>, vector<1x128xf32>
    %15 = vector.broadcast %14 : vector<1x128xf32> to vector<112x128xf32>
    %16 = arith.addf %13, %15 : vector<112x128xf32>
    %cst_16 = arith.constant 0.000000e+00 : f32
    %17 = vector.broadcast %cst_16 : f32 to vector<112x128xf32>
    %18 = arith.maximumf %16, %17 : vector<112x128xf32>
    %c0_17 = arith.constant 0 : index
    %c0_18 = arith.constant 0 : index
    %19 = vector.load %arg8[%c0_17, %c0_18] : memref<1x128xf32, #tpu.memory_space<vmem>>, vector<1x128xf32>
    %cst_19 = arith.constant dense<0.000000e+00> : vector<1x112xf32>
    %20 = tpu.matmul %19, %18, %cst_19 {dimension_numbers = #tpu.dot_dimension_numbers<[1], [1], [0], [0], [0, 0, 1, 0], [], []>} : vector<1x128xf32>, vector<112x128xf32>, vector<1x112xf32> -> vector<1x112xf32>
    %c0_20 = arith.constant 0 : index
    %21 = memref.load %arg9[%c0_20] : memref<1xf32, #tpu.memory_space<smem>>
    %22 = vector.broadcast %21 : f32 to vector<1x112xf32>
    %23 = arith.addf %20, %22 : vector<1x112xf32>
    %24 = vector.shape_cast %23 : vector<1x112xf32> to vector<1x1x112xf32>
    %c0_21 = arith.constant 0 : index
    %c0_22 = arith.constant 0 : index
    %c0_23 = arith.constant 0 : index
    %25 = vector.load %arg10[%c0_21, %c0_22, %c0_23] : memref<1x1x112xf32, #tpu.memory_space<vmem>>, vector<1x1x112xf32>
    tpu.vector_store %arg10[%c0_21, %c0_22, %c0_23], %24 {strides = array<i32>} : memref<1x1x112xf32, #tpu.memory_space<vmem>>, vector<1x1x112xf32>,
    return
  }
  func.func @transform_0(%arg0: i32) -> (i32, i32) {
    %c0_i32 = arith.constant 0 : i32
    %c0_i32_0 = arith.constant 0 : i32
    return %arg0, %c0_i32 : i32, i32
  }
  func.func @transform_1(%arg0: i32) -> (i32, i32) {
    %c0_i32 = arith.constant 0 : i32
    %c0_i32_0 = arith.constant 0 : i32
    return %arg0, %c0_i32 : i32, i32
  }
  func.func @transform_2(%arg0: i32) -> (i32, i32) {
    %c0_i32 = arith.constant 0 : i32
    %c0_i32_0 = arith.constant 0 : i32
    %c0_i32_1 = arith.constant 0 : i32
    return %c0_i32, %c0_i32_0 : i32, i32
  }
  func.func @transform_3(%arg0: i32) -> (i32, i32) {
    %c0_i32 = arith.constant 0 : i32
    %c0_i32_0 = arith.constant 0 : i32
    %c0_i32_1 = arith.constant 0 : i32
    return %c0_i32, %c0_i32_0 : i32, i32
  }
  func.func @transform_4(%arg0: i32) -> (i32, i32) {
    %c0_i32 = arith.constant 0 : i32
    %c0_i32_0 = arith.constant 0 : i32
    %c0_i32_1 = arith.constant 0 : i32
    return %c0_i32, %c0_i32_0 : i32, i32
  }
  func.func @transform_5(%arg0: i32) -> (i32, i32) {
    %c0_i32 = arith.constant 0 : i32
    %c0_i32_0 = arith.constant 0 : i32
    %c0_i32_1 = arith.constant 0 : i32
    return %c0_i32, %c0_i32_0 : i32, i32
  }
  func.func @transform_6(%arg0: i32) -> (i32, i32) {
    %c0_i32 = arith.constant 0 : i32
    %c0_i32_0 = arith.constant 0 : i32
    %c0_i32_1 = arith.constant 0 : i32
    return %c0_i32, %c0_i32_0 : i32, i32
  }
  func.func @transform_7(%arg0: i32) -> (i32, i32) {
    %c0_i32 = arith.constant 0 : i32
    %c0_i32_0 = arith.constant 0 : i32
    %c0_i32_1 = arith.constant 0 : i32
    return %c0_i32, %c0_i32_0 : i32, i32
  }
  func.func @transform_8(%arg0: i32) -> i32 {
    %c0_i32 = arith.constant 0 : i32
    %c0_i32_0 = arith.constant 0 : i32
    return %c0_i32 : i32
  }
  func.func @transform_9(%arg0: i32) -> (i32, i32, i32) {
    %c0_i32 = arith.constant 0 : i32
    %c0_i32_0 = arith.constant 0 : i32
    %c0_i32_1 = arith.constant 0 : i32
    return %arg0, %c0_i32, %c0_i32_0 : i32, i32, i32
  }
}

</mosaic_0001>

<bundles_post_ra>
// kernel: tpu_custom_call.1
= control target key start
LH: loop header
LB: loop body
LE: loop exit
PB: predicated region body
PF: predicated region fallthrough
CT: control target
= control target key end

     0   :  { %vm66_vm0 = vcmask 64512   ;;  %vm244_vm1 = vcmask 195584   ;;  %s1331_s0 = inlined_call_operand.vmem [shape: f32[112,24], index: 0, kind: input, shape index: {}]   ;;  %s1332_s1 = inlined_call_operand.vmem [shape: f32[112,8], index: 1, kind: input, shape index: {}]   ;;  %s1333_s2 = inlined_call_operand.vmem [shape: f32[24,128], index: 2, kind: input, shape index: {}]   ;;  %s1334_s3 = inlined_call_operand.vmem [shape: f32[8,128], index: 3, kind: input, shape index: {}]   ;;  %s1335_s4 = inlined_call_operand.vmem [shape: f32[1,128], index: 4, kind: input, shape index: {}]   ;;  %s1336_s5 = inlined_call_operand.vmem [shape: f32[128,128], index: 5, kind: input, shape index: {}]   ;;  %s1337_s6 = inlined_call_operand.vmem [shape: f32[1,128], index: 6, kind: input, shape index: {}]   ;;  %s1338_s7 = inlined_call_operand.vmem [shape: f32[1,128], index: 7, kind: input, shape index: {}]   ;;  %s1339_s8 = inlined_call_operand.<no memory space> [shape: f32[1], index: 8, kind: input, shape index: {}]   ;;  %s1340_s9 = inlined_call_operand.hbm [shape: f32[1,1,112], index: 9, kind: output, shape index: {}]  }
   0x1   :  { %v48_v0 = vld [vmem:[%s1333_s2] sm:$0xff]  ;;  %v49_v1 = vld [vmem:[%s1333_s2 + $0x8] sm:$0xff]  ;;  %v50_v6 = vld [vmem:[%s1333_s2 + $0x10] sm:$0xff] }
   0x2   :  { %v65_v2 = vld [vmem:[%s1334_s3] sm:$0xff]  ;;  %v959_v3 = vpack.c.bf16 %v49_v1, %v48_v0  ;;  %v52_v5 = vld [vmem:[%s1332_s1 + $0x8] sm:$0xff]  ;;  %v53_v8 = vld [vmem:[%s1332_s1 + $0x10] sm:$0xff] }
   0x3   :  { %825 = vmatprep.subr.mxu1 %v65_v2  ;;  %v51_v4 = vld [vmem:[%s1332_s1] sm:$0xff]  ;;  %v54_v9 = vld [vmem:[%s1332_s1 + $0x18] sm:$0xff]  ;;  %v35_v11 = vld [vmem:[%s1331_s0 + $0x8] sm:$0xff] }
   0x4   :  { %826 = vmatpush3.msra.mxu1 %v65_v2  ;;  %827 = vmatprep.mubr.msk.f32.mxu1 %vm66_vm0, %v51_v4  ;;  %v34_v7 = vld [vmem:[%s1331_s0] sm:$0xff]  ;;  %v36_v12 = vld [vmem:[%s1331_s0 + $0x10] sm:$0xff]  ;;  %v56_v13 = vld [vmem:[%s1332_s1 + $0x28] sm:$0xff] }
   0x5   :  { %960 = vmatprep.subr.bf16.mxu0 %v959_v3  ;;  %828 = vmatmul.mubr.msk.f32.vlgmr.msra.gmra.mrb[0].mxu1 %vm66_vm0, %v52_v5  ;;  %v55_v10 = vld [vmem:[%s1332_s1 + $0x20] sm:$0xff]  ;;  %v57_v14 = vld [vmem:[%s1332_s1 + $0x30] sm:$0xff]  ;;  %v37_v15 = vld [vmem:[%s1331_s0 + $0x18] sm:$0xff] }
   0x6   :  { %962 = vmatpush3.bf16.msra.mxu0 %v959_v3  ;;  %854 = vmatprep.mubr.msk.f32.mxu0 %vm244_vm1, %v34_v7  ;;  %v38_v16 = vld [vmem:[%s1331_s0 + $0x20] sm:$0xff]  ;;  %v458_v18 = vld [vmem:[%s1336_s5 + $0x8] sm:$0xff]  ;;  %v459_v19 = vld [vmem:[%s1336_s5 + $0x10] sm:$0xff] }
   0x7   :  { %852 = vmatprep.subr.mxu0 %v50_v6  ;;  %830 = vmatprep.mubr.msk.f32.mxu1 %vm66_vm0, %v53_v8  ;;  %v457_v17 = vld [vmem:[%s1336_s5] sm:$0xff]  ;;  %v460_v20 = vld [vmem:[%s1336_s5 + $0x18] sm:$0xff]  ;;  %v39_v23 = vld [vmem:[%s1331_s0 + $0x28] sm:$0xff] }
   0x8   :  { %v58_v21 = vld [vmem:[%s1332_s1 + $0x38] sm:$0xff]  ;;  %v963_v22 = vpack.c.bf16 %v458_v18, %v457_v17  ;;  %v59_v24 = vld [vmem:[%s1332_s1 + $0x40] sm:$0xff]  ;;  %v967_v25 = vpack.c.bf16 %v460_v20, %v459_v19  ;;  %v462_v27 = vld [vmem:[%s1336_s5 + $0x28] sm:$0xff] }
   0x9   :  { %831 = vmatmul.mubr.msk.f32.gmra.mrb[2].mxu1 %vm66_vm0, %v54_v9  ;;  %v461_v26 = vld [vmem:[%s1336_s5 + $0x20] sm:$0xff] }
   0xa   :  { %853 = vmatpush3.msra.mxu0 %v50_v6  ;;  %833 = vmatprep.mubr.msk.f32.mxu1 %vm66_vm0, %v55_v10 }
   0xb   :  { %855 = vmatmul.mubr.msk.f32.vlgmr.msra.gmra.mrb[0].mxu0 %vm244_vm1, %v35_v11  ;;  %964 = vmatprep.subr.bf16.mxu1 %v963_v22 }
   0xc   :  { %857 = vmatprep.mubr.msk.f32.mxu0 %vm244_vm1, %v36_v12 }
   0xd   :  { %834 = vmatmul.mubr.msk.f32.gmra.mrb[4].mxu1 %vm66_vm0, %v56_v13 }
   0xe   :  { %836 = vmatprep.mubr.msk.f32.mxu1 %vm66_vm0, %v57_v14 }
   0xf   :  { %858 = vmatmul.mubr.msk.f32.gmra.mrb[2].mxu0 %vm244_vm1, %v37_v15 }
  0x10   :  { %860 = vmatprep.mubr.msk.f32.mxu0 %vm244_vm1, %v38_v16 }
  0x11   :  { %15 = vsyncpa [#allocation4], 0  ;;  %v40_v28 = vld [vmem:[%s1331_s0 + $0x30] sm:$0xff]  ;;  %837 = vmatmul.mubr.msk.f32.gmra.mrb[6].mxu1 %vm66_vm0, %v58_v21  ;;  %v60_v29 = vld [vmem:[%s1332_s1 + $0x48] sm:$0xff]  ;;  %v971_v31 = vpack.c.bf16 %v462_v27, %v461_v26  ;;  %vm1059_vm2 = vmmov 0   ;;  %s1061_s16 = smov [#allocation3]  }
  0x12   :  { %839 = vmatprep.mubr.msk.f32.mxu1 %vm66_vm0, %v59_v24  ;;  %966 = vmatpush3.bf16.msra.mxu1 %v963_v22  ;;  %v61_v30 = vld [vmem:[%s1332_s1 + $0x50] sm:$0xff]  ;;  %v41_v32 = vld [vmem:[%s1331_s0 + $0x38] sm:$0xff]  ;;  %v42_v35 = vld [vmem:[%s1331_s0 + $0x40] sm:$0xff]  ;;  %s710_s17 = sshll.u32 %s1061_s16, 4  ;;  %vm702_vm3 = vcmask 909312   ;;  %s711_s17 = int_to_ptr.vmem [resolvable:$true] %s710_s17 }
  0x13   :  { %861 = vmatmul.mubr.msk.f32.gmra.mrb[4].mxu0 %vm244_vm1, %v39_v23  ;;  %968 = vmatprep.subr.bf16.mxu1 %v967_v25  ;;  %v463_v33 = vld [vmem:[%s1336_s5 + $0x30] sm:$0xff]  ;;  %v464_v34 = vld [vmem:[%s1336_s5 + $0x38] sm:$0xff]  ;;  %v63_v37 = vld [vmem:[%s1332_s1 + $0x60] sm:$0xff]  ;;  %s1034_s18 = scalar_lea.vmem %s711_s17, 16  ;;  %s1038_s19 = scalar_lea.vmem %s711_s17, 32 }
  0x14   :  { %863 = vmatprep.mubr.msk.f32.mxu0 %vm244_vm1, %v40_v28  ;;  %v62_v36 = vld [vmem:[%s1332_s1 + $0x58] sm:$0xff]  ;;  %v975_v38 = vpack.c.bf16 %v464_v34, %v463_v33  ;;  %v43_v39 = vld [vmem:[%s1331_s0 + $0x48] sm:$0xff]  ;;  %v465_v40 = vld [vmem:[%s1336_s5 + $0x40] sm:$0xff]  ;;  %p1035_p0 = scmp.ne.s32.totalorder %s711_s17, %s1034_s18  ;;  %p1039_p1 = scmp.lt.s32.totalorder %s711_s17, %s711_s17 }
  0x15   :  { %840 = vmatmul.mubr.msk.f32.gmra.mrb[8].mxu1 %vm66_vm0, %v60_v29  ;;  %v466_v41 = vld [vmem:[%s1336_s5 + $0x48] sm:$0xff]  ;;  %v44_v42 = vld [vmem:[%s1331_s0 + $0x50] sm:$0xff]  ;;  %v45_v45 = vld [vmem:[%s1331_s0 + $0x58] sm:$0xff]  ;;  %p1040_p2 = scmp.lt.s32.totalorder %s1038_s19, %s1034_s18 }
  0x16   :  { %842 = vmatprep.mubr.msk.f32.mxu1 %vm66_vm0, %v61_v30  ;;  %970 = vmatpush3.bf16.msra.mxu1 %v967_v25  ;;  %v64_v43 = vld [vmem:[%s1332_s1 + $0x68] sm:$0xff]  ;;  %v979_v44 = vpack.c.bf16 %v466_v41, %v465_v40  ;;  %v467_v46 = vld [vmem:[%s1336_s5 + $0x50] sm:$0xff]  ;;  %v468_v47 = vld [vmem:[%s1336_s5 + $0x58] sm:$0xff] }
  0x17   :  { %864 = vmatmul.mubr.msk.f32.gmra.mrb[6].mxu0 %vm244_vm1, %v41_v32  ;;  %972 = vmatprep.subr.bf16.mxu1 %v971_v31  ;;  %v46_v48 = vld [vmem:[%s1331_s0 + $0x60] sm:$0xff]  ;;  %v983_v49 = vpack.c.bf16 %v468_v47, %v467_v46  ;;  %v47_v50 = vld [vmem:[%s1331_s0 + $0x68] sm:$0xff]  ;;  %v471_v54 = vld [vmem:[%s1336_s5 + $0x70] sm:$0xff]  ;;  %p1041_p3 = por %p1040_p2, %p1039_p1 }
  0x18   :  { %866 = vmatprep.mubr.msk.f32.mxu0 %vm244_vm1, %v42_v35  ;;  %v469_v51 = vld [vmem:[%s1336_s5 + $0x60] sm:$0xff]  ;;  %v470_v52 = vld [vmem:[%s1336_s5 + $0x68] sm:$0xff]  ;;  %v472_v55 = vld [vmem:[%s1336_s5 + $0x78] sm:$0xff] }
  0x19   :  { %843 = vmatmul.mubr.msk.f32.gmra.mrb[10].mxu1 %vm66_vm0, %v62_v36  ;;  %v987_v53 = vpack.c.bf16 %v470_v52, %v469_v51  ;;  %v991_v56 = vpack.c.bf16 %v472_v55, %v471_v54  ;;  %v1287_v62 = vld [vmem:[%s1335_s4] ss:$0 sm:$0xff]  ;;  %p1042_p4 = pnand %p1041_p3, %p1035_p0 }
  0x1a   :  { %845 = vmatprep.mubr.msk.f32.mxu1 %vm66_vm0, %v63_v37  ;;  %974 = vmatpush3.bf16.msra.mxu1 %v971_v31 }
  0x1b   :  { %867 = vmatmul.mubr.msk.f32.gmra.mrb[8].mxu0 %vm244_vm1, %v43_v39  ;;  %976 = vmatprep.subr.bf16.mxu1 %v975_v38 }
  0x1c   :  { %869 = vmatprep.mubr.msk.f32.mxu0 %vm244_vm1, %v44_v42 }
  0x1d   :  { %846 = vmatmul.mubr.msk.f32.gmra.mrb[12].mxu1 %vm66_vm0, %v64_v43 }
  0x1e   :  { %978 = vmatpush3.bf16.msra.mxu1 %v975_v38 }
  0x1f   :  { %870 = vmatmul.mubr.msk.f32.gmra.mrb[10].mxu0 %vm244_vm1, %v45_v45  ;;  %980 = vmatprep.subr.bf16.mxu1 %v979_v44 }
  0x20   :  { %872 = vmatprep.mubr.msk.f32.mxu0 %vm244_vm1, %v46_v48 }
  0x22   :  { %982 = vmatpush3.bf16.msra.mxu1 %v979_v44 }
  0x23   :  { %873 = vmatmul.mubr.msk.f32.gmra.mrb[12].mxu0 %vm244_vm1, %v47_v50  ;;  %984 = vmatprep.subr.bf16.mxu1 %v983_v49 }
  0x26   :  { %986 = vmatpush3.bf16.msra.mxu1 %v983_v49 }
  0x27   :  { %988 = vmatprep.subr.bf16.mxu1 %v987_v53 }
  0x2a   :  { %990 = vmatpush3.bf16.msra.mxu1 %v987_v53 }
  0x2b   :  { %992 = vmatprep.subr.bf16.mxu1 %v991_v56 }
  0x2e   :  { %994 = vmatpush3.bf16.msra.mxu1 %v991_v56 }
  0xd8   :  { %v829_v57 = vpop.f32.mrb[0].mxu1 }
  0xd9   :  { %v175_v58 = vpop.f32.mrb[1].mxu1 }
  0xdc   :  { %v832_v59 = vpop.f32.mrb[2].mxu1 }
  0xdd   :  { %v185_v60 = vpop.f32.mrb[3].mxu1 }
  0xde   :  { %v856_v61 = vpop.f32.mrb[0].mxu0 }
  0xdf   :  { %v359_v63 = vadd.f32 %v856_v61, %v829_v57  ;;  %v353_v0 = vpop.f32.mrb[1].mxu0 }
  0xe0   :  { %v354_v1 = vadd.f32 %v353_v0, %v175_v58  ;;  %v835_v2 = vpop.f32.mrb[4].mxu1 }
  0xe1   :  { %v430_v3 = vadd.f32 %v1287_v62, %v359_v63  ;;  %v195_v4 = vpop.f32.mrb[5].mxu1 }
  0xe2   :  { %v429_v5 = vadd.f32 %v1287_v62, %v354_v1  ;;  %v859_v6 = vpop.f32.mrb[2].mxu0  ;;  %v1058_v1 = vmov 0.0|0.0  }
  0xe3   :  { %v369_v7 = vadd.f32 %v859_v6, %v832_v59  ;;  %v363_v8 = vpop.f32.mrb[3].mxu0  ;;  %v444_v12 = vmax.f32 %v430_v3, 0.0  ;;  %995 = vmatprep.subr.bf16.mxu0 %v1058_v1  ;;  %v747_v3 = vld [vmem:[%s1337_s6] ss:$0 sm:$0xff] }
  0xe4   :  { %v443_v9 = vmax.f32 %v429_v5, 0.0  ;;  %v364_v10 = vadd.f32 %v363_v8, %v185_v60  ;;  %v838_v11 = vpop.f32.mrb[6].mxu1 }
  0xe5   :  { %v432_v13 = vadd.f32 %v1287_v62, %v369_v7  ;;  %v205_v14 = vpop.f32.mrb[7].mxu1 }
  0xe6   :  { %v431_v15 = vadd.f32 %v1287_v62, %v364_v10  ;;  %907 = vmatprep.mubr.f32.mxu1 %v443_v9  ;;  %v862_v16 = vpop.f32.mrb[4].mxu0 }
  0xe7   :  { %v446_v17 = vmax.f32 %v432_v13, 0.0  ;;  %908 = vmatmul.mubr.f32.vlgmr.msra.gmra.mrb[14].mxu1 %v444_v12  ;;  %v379_v18 = vadd.f32 %v862_v16, %v835_v2  ;;  %v373_v19 = vpop.f32.mrb[5].mxu0  ;;  %v1060_v2 = vmov 0.0  }
  0xe8   :  { %v445_v20 = vmax.f32 %v431_v15, 0.0  ;;  %v374_v21 = vadd.f32 %v373_v19, %v195_v4  ;;  %v841_v22 = vpop.f32.mrb[8].mxu1  ;;  %956 = vmatprep.mubr.msk.f32.mxu0 %vm1059_vm2, %v1060_v2 }
  0xe9   :  { %v434_v23 = vadd.f32 %v1287_v62, %v379_v18  ;;  %v215_v24 = vpop.f32.mrb[9].mxu1 }
  0xea   :  { %910 = vmatprep.mubr.f32.mxu1 %v445_v20  ;;  %v433_v25 = vadd.f32 %v1287_v62, %v374_v21  ;;  %v865_v26 = vpop.f32.mrb[6].mxu0 }
  0xeb   :  { %v448_v27 = vmax.f32 %v434_v23, 0.0  ;;  %911 = vmatmul.mubr.f32.gmra.mrb[16].mxu1 %v446_v17  ;;  %v389_v28 = vadd.f32 %v865_v26, %v838_v11  ;;  %v383_v29 = vpop.f32.mrb[7].mxu0 }
  0xec   :  { %v447_v30 = vmax.f32 %v433_v25, 0.0  ;;  %v384_v31 = vadd.f32 %v383_v29, %v205_v14  ;;  %v844_v32 = vpop.f32.mrb[10].mxu1 }
  0xed   :  { %v436_v33 = vadd.f32 %v1287_v62, %v389_v28  ;;  %v225_v34 = vpop.f32.mrb[11].mxu1 }
  0xee   :  { %913 = vmatprep.mubr.f32.mxu1 %v447_v30  ;;  %v435_v35 = vadd.f32 %v1287_v62, %v384_v31  ;;  %v868_v36 = vpop.f32.mrb[8].mxu0 }
  0xef   :  { %v450_v37 = vmax.f32 %v436_v33, 0.0  ;;  %914 = vmatmul.mubr.f32.gmra.mrb[18].mxu1 %v448_v27  ;;  %v399_v38 = vadd.f32 %v868_v36, %v841_v22  ;;  %v393_v39 = vpop.f32.mrb[9].mxu0 }
  0xf0   :  { %v449_v40 = vmax.f32 %v435_v35, 0.0  ;;  %v394_v41 = vadd.f32 %v393_v39, %v215_v24  ;;  %v847_v42 = vpop.f32.mrb[12].mxu1 }
  0xf1   :  { %v438_v43 = vadd.f32 %v1287_v62, %v399_v38  ;;  %v235_v44 = vpop.f32.mrb[13].mxu1 }
  0xf2   :  { %916 = vmatprep.mubr.f32.mxu1 %v449_v40  ;;  %v437_v45 = vadd.f32 %v1287_v62, %v394_v41  ;;  %v871_v46 = vpop.f32.mrb[10].mxu0 }
  0xf3   :  { %v452_v47 = vmax.f32 %v438_v43, 0.0  ;;  %917 = vmatmul.mubr.f32.gmra.mrb[20].mxu1 %v450_v37  ;;  %v409_v48 = vadd.f32 %v871_v46, %v844_v32  ;;  %v403_v49 = vpop.f32.mrb[11].mxu0 }
  0xf4   :  { %v451_v50 = vmax.f32 %v437_v45, 0.0  ;;  %v404_v51 = vadd.f32 %v403_v49, %v225_v34 }
  0xf5   :  { %v440_v52 = vadd.f32 %v1287_v62, %v409_v48 }
  0xf6   :  { %919 = vmatprep.mubr.f32.mxu1 %v451_v50  ;;  %v439_v53 = vadd.f32 %v1287_v62, %v404_v51  ;;  %v874_v54 = vpop.f32.mrb[12].mxu0 }
  0xf7   :  { %v454_v55 = vmax.f32 %v440_v52, 0.0  ;;  %920 = vmatmul.mubr.f32.gmra.mrb[22].mxu1 %v452_v47  ;;  %v419_v56 = vadd.f32 %v874_v54, %v847_v42  ;;  %v413_v57 = vpop.f32.mrb[13].mxu0  ;;  %v629_v52 = vld [vmem:[%s1338_s7] sm:$0x1] }
  0xf8   :  { %v453_v58 = vmax.f32 %v439_v53, 0.0  ;;  %v414_v59 = vadd.f32 %v413_v57, %v235_v44  ;;  %v631_v53 = vstv %s1339_s8 }
  0xf9   :  { %v442_v60 = vadd.f32 %v1287_v62, %v419_v56 }
  0xfa   :  { %922 = vmatprep.mubr.f32.mxu1 %v453_v58  ;;  %v441_v61 = vadd.f32 %v1287_v62, %v414_v59 }
  0xfb   :  { %v456_v63 = vmax.f32 %v442_v60, 0.0  ;;  %923 = vmatmul.mubr.f32.gmra.mrb[24].mxu1 %v454_v55 }
  0xfc   :  { %v455_v0 = vmax.f32 %v441_v61, 0.0 }
  0xfe   :  { %925 = vmatprep.mubr.f32.mxu1 %v455_v0 }
  0xff   :  { %926 = vmatmul.mubr.f32.gmra.mrb[26].mxu1 %v456_v63 }
 0x1ba   :  { %v909_v4 = vpop.f32.mrb[14].mxu1 }
 0x1bb   :  { %v552_v5 = vadd.f32 %v909_v4, %v747_v3  ;;  %v546_v6 = vpop.f32.mrb[15].mxu1 }
 0x1bc   :  { %v547_v7 = vadd.f32 %v747_v3, %v546_v6 }
 0x1bd   :  { %v616_v62 = vmax.f32 %v552_v5, 0.0 }
 0x1be   :  { %v615_v8 = vmax.f32 %v547_v7, 0.0  ;;  %v912_v9 = vpop.f32.mrb[16].mxu1 }
 0x1bf   :  { %v562_v10 = vadd.f32 %v912_v9, %v747_v3  ;;  %v556_v11 = vpop.f32.mrb[17].mxu1 }
 0x1c0   :  { %v996_v12 = vpack.c.bf16 %v616_v62, %v615_v8  ;;  %v557_v13 = vadd.f32 %v747_v3, %v556_v11 }
 0x1c1   :  { %v618_v14 = vmax.f32 %v562_v10, 0.0 }
 0x1c2   :  { %v617_v15 = vmax.f32 %v557_v13, 0.0  ;;  %997 = vmatpush3.bf16.xpose.msra.mxu0 %v996_v12  ;;  %v915_v16 = vpop.f32.mrb[18].mxu1 }
 0x1c3   :  { %v572_v17 = vadd.f32 %v915_v16, %v747_v3  ;;  %v566_v18 = vpop.f32.mrb[19].mxu1  ;;  %998 = vmatprep.subr.bf16.mxu0 %v1058_v1 }
 0x1c4   :  { %v999_v19 = vpack.c.bf16 %v618_v14, %v617_v15  ;;  %v567_v20 = vadd.f32 %v747_v3, %v566_v18 }
 0x1c5   :  { %v620_v21 = vmax.f32 %v572_v17, 0.0 }
 0x1c6   :  { %v619_v22 = vmax.f32 %v567_v20, 0.0  ;;  %v918_v23 = vpop.f32.mrb[20].mxu1 }
 0x1c7   :  { %v582_v24 = vadd.f32 %v918_v23, %v747_v3  ;;  %v576_v25 = vpop.f32.mrb[21].mxu1 }
 0x1c8   :  { %v1002_v26 = vpack.c.bf16 %v620_v21, %v619_v22  ;;  %v577_v27 = vadd.f32 %v747_v3, %v576_v25 }
 0x1c9   :  { %v622_v28 = vmax.f32 %v582_v24, 0.0 }
 0x1ca   :  { %1000 = vmatpush3.bf16.xpose.msra.mxu0 %v999_v19  ;;  %v621_v29 = vmax.f32 %v577_v27, 0.0  ;;  %v921_v30 = vpop.f32.mrb[22].mxu1 }
 0x1cb   :  { %1001 = vmatprep.subr.bf16.mxu0 %v1058_v1  ;;  %v592_v31 = vadd.f32 %v921_v30, %v747_v3  ;;  %v586_v32 = vpop.f32.mrb[23].mxu1 }
 0x1cc   :  { %v1005_v33 = vpack.c.bf16 %v622_v28, %v621_v29  ;;  %v587_v34 = vadd.f32 %v747_v3, %v586_v32 }
 0x1cd   :  { %v624_v35 = vmax.f32 %v592_v31, 0.0 }
 0x1ce   :  { %v623_v36 = vmax.f32 %v587_v34, 0.0  ;;  %v924_v37 = vpop.f32.mrb[24].mxu1 }
 0x1cf   :  { %v602_v38 = vadd.f32 %v924_v37, %v747_v3  ;;  %v596_v39 = vpop.f32.mrb[25].mxu1 }
 0x1d0   :  { %v1008_v40 = vpack.c.bf16 %v624_v35, %v623_v36  ;;  %v597_v41 = vadd.f32 %v747_v3, %v596_v39 }
 0x1d1   :  { %v626_v42 = vmax.f32 %v602_v38, 0.0 }
 0x1d2   :  { %1003 = vmatpush3.bf16.xpose.msra.mxu0 %v1002_v26  ;;  %v625_v43 = vmax.f32 %v597_v41, 0.0  ;;  %v927_v44 = vpop.f32.mrb[26].mxu1 }
 0x1d3   :  { %1004 = vmatprep.subr.bf16.mxu0 %v1058_v1  ;;  %v612_v45 = vadd.f32 %v927_v44, %v747_v3  ;;  %v606_v46 = vpop.f32.mrb[27].mxu1 }
 0x1d4   :  { %v1011_v47 = vpack.c.bf16 %v626_v42, %v625_v43  ;;  %v607_v48 = vadd.f32 %v747_v3, %v606_v46 }
 0x1d5   :  { %v628_v49 = vmax.f32 %v612_v45, 0.0 }
 0x1d6   :  { %v627_v50 = vmax.f32 %v607_v48, 0.0 }
 0x1d8   :  { %v1014_v51 = vpack.c.bf16 %v628_v49, %v627_v50 }
 0x1da   :  { %1006 = vmatpush3.bf16.xpose.msra.mxu0 %v1005_v33 }
 0x1db   :  { %1007 = vmatprep.subr.bf16.mxu0 %v1058_v1 }
 0x1e2   :  { %1009 = vmatpush3.bf16.xpose.msra.mxu0 %v1008_v40 }
 0x1e3   :  { %1010 = vmatprep.subr.bf16.mxu0 %v1058_v1 }
 0x1ea   :  { %1012 = vmatpush3.bf16.xpose.msra.mxu0 %v1011_v47 }
 0x1eb   :  { %1013 = vmatprep.subr.bf16.mxu0 %v1058_v1 }
 0x1f2   :  { %1015 = vmatpush3.bf16.xpose.msra.mxu0 %v1014_v51 }
 0x1f9   :  { %957 = vmatmul.mubr.f32.vlgmr.msra.gmra.mrb[14].mxu0 %v629_v52 }
 0x2cc   :  { %v698_v54 = vpop.f32.mrb[14].mxu0 }
 0x2cd   :  { %v699_v55 = vadd.f32 %v698_v54, %v631_v53  ;;  %v958_v56 = vpop.f32.mrb[15].mxu0 }
 0x2cf   :  { %703 = vst.msk [vmem:[#allocation3] sm:$0x1] %vm702_vm3, %v699_v55 }
 0x2d0   :  { %1045 = shalt.err (!%p1042_p4)
}
 0x2d1   :  { %s1046_s8 = scalar_lea.hbm %s1340_s9, 16 }
 0x2d2   :  { %p1047_p5 = scmp.ne.s32.totalorder %s1340_s9, %s1046_s8  ;;  %p1050_p6 = scmp.lt.u32.totalorder %s1046_s8, %s1340_s9 }
 0x2d4   :  { %p1052_p7 = pnand %p1050_p6, %p1047_p5 }
 0x2d6   :  { %1055 = shalt.err (!%p1052_p7)
}
 0x2d7   :  { %713 = dma.vmem_to_hbm [thread:$0]  %s711_s17, 16, %s1340_s9, [#allocation4]  }
 0x2d8   :  { %1056 = dma.done.wait [#allocation4], 16  }
 0x2d9   :  { %1057 = vsyncadd [#allocation4], 4294967280 }
 0x2da   :  { %717 = vsyncpa [#allocation4], 1 }

</bundles_post_ra>
